<compile_context>
chip_gen: v6e
topology: v6e:2x2x1
jax: 0.10.0
libtpu: 0.0.40
codegen_flags: <defaults>
</compile_context>

<pallas_src>
import jax
import jax.numpy as jnp
import numpy as np
from jax.experimental import pallas as pl
from jax.experimental.pallas import tpu as pltpu

BN_EPS = 1e-5


# ----------------------------- Pallas kernels ------------------------------

def conv_stats_kernel(p_ref, w_ref, st_ref):
    """Pass 1: fused all-branch conv matmul -> per-tile BN statistics only.

    p_ref : (TM, Kpad)   bf16 im2col patch tile
    w_ref : (Kpad, Cpad) bf16 fused (1x1 | 3x3 | 5x5) weight matrix
    st_ref: (8, Cpad)    f32 partial stats (row 0 = sum(z), row 1 = sum(z*z))
    """
    z = jnp.dot(p_ref[...], w_ref[...], preferred_element_type=jnp.float32)
    s1 = jnp.sum(z, axis=0, keepdims=True)
    s2 = jnp.sum(z * z, axis=0, keepdims=True)
    # Build the (8, Cpad) tile in registers and store once (single unmasked
    # lane-dense store instead of a zero-fill plus two masked 1-row stores).
    pad = jnp.zeros((6, s1.shape[1]), jnp.float32)
    st_ref[...] = jnp.concatenate([s1, s2, pad], axis=0)


def conv_bn_relu_kernel(p_ref, w_ref, scale_ref, shift_ref, o_ref):
    """Pass 2: recompute the conv matmul and fuse BN affine + ReLU into the
    output store.  No intermediate `z` ever touches HBM."""
    z = jnp.dot(p_ref[...], w_ref[...], preferred_element_type=jnp.float32)
    y = z * scale_ref[...] + shift_ref[...]
    o_ref[...] = jnp.maximum(y, 0.0).astype(o_ref.dtype)


# ------------------------------ wrapper ------------------------------------

def _round_up(v, m):
    return ((v + m - 1) // m) * m


def _pick_row_tile(m_pad):
    """Largest row tile in {1024, 512, 256} that divides m_pad and still
    leaves a grid of >= 2 steps (keeps both v7x TensorCores busy)."""
    for cand in (1024, 512):
        if m_pad % cand == 0 and m_pad // cand >= 2:
            return cand
    return 256


def inception_block(x_nchw, params):
    """InceptionBlock forward.  x_nchw: (N, Cin, H, W) -> (N, 3*Cout, H, W)."""
    x = jnp.transpose(x_nchw, (0, 2, 3, 1)).astype(jnp.float32)  # NCHW -> NHWC
    N, H, W, Cin = x.shape
    Cout = params["w5"].shape[-1]
    K = 5
    C3 = 3 * Cout

    # --- fuse the three branch weights onto the 5x5 tap grid, concat on Cout ---
    def embed(w):
        k = w.shape[0]
        off = (K - k) // 2
        full = jnp.zeros((K, K, Cin, Cout), jnp.float32)
        return full.at[off:off + k, off:off + k].set(w)

    wf = jnp.concatenate([embed(params["w1"]), embed(params["w3"]),
                          embed(params["w5"])], axis=-1)       # (5,5,Cin,3*Cout)
    wf = wf.reshape(K * K * Cin, C3)

    # --- im2col in the wrapper (lane-dense operand for the kernels) ---
    # TODO(synk): stop materializing the im2col matrix in HBM: pass the padded
    # NHWC image with memory_space=pl.ANY, DMA row slabs with a 2-row halo into
    # VMEM and build the 25 taps in-kernel via shifted slices.  For realistic
    # Cin that removes the ~12.5x-inflated P read (plus its extra XLA write);
    # kept out of this revision to stay on the known-good Mosaic lowering path.
    xp = jnp.pad(x, ((0, 0), (2, 2), (2, 2), (0, 0)))
    taps = [xp[:, ky:ky + H, kx:kx + W, :] for ky in range(K) for kx in range(K)]
    P = jnp.concatenate(taps, axis=-1).reshape(N * H * W, K * K * Cin)

    # --- pad to MXU/vreg-friendly shapes ---
    M = N * H * W
    Kdim = K * K * Cin
    Kpad = _round_up(max(Kdim, 128), 128)
    Cpad = _round_up(max(C3, 128), 128)
    Mpad = _round_up(M, 256)
    TM = _pick_row_tile(Mpad)
    G = Mpad // TM

    # bf16 operands, f32 accumulation on the MXU.  Zero-padded rows contribute
    # nothing to the statistics (they are divided by the real M) and padded
    # channel columns get scale = shift = 0 below, so they stay 0 and are
    # sliced off at the end.
    P = jnp.pad(P, ((0, Mpad - M), (0, Kpad - Kdim))).astype(jnp.bfloat16)
    wf = jnp.pad(wf, ((0, Kpad - Kdim), (0, Cpad - C3))).astype(jnp.bfloat16)

    cparams = pltpu.CompilerParams(
        dimension_semantics=("parallel",),
        # 64 MiB fits all of v5e/v6e (128 MiB physical) and v7x (64 MiB).
        # TODO(synk): on v7x with very large fused weights (Kpad*Cpad bf16 in
        # the tens of MiB) add an output-channel grid axis so the weight
        # pipelines along Cpad instead of sitting resident in VMEM.
        vmem_limit_bytes=64 * 1024 * 1024,
    )

    # The fused weight's block index never changes -> single-buffer it
    # (double buffering a constant operand only burns VMEM).
    w_spec = pl.BlockSpec((Kpad, Cpad), lambda i: (0, 0),
                          pipeline_mode=pl.Buffered(1))

    # --- pass 1: conv matmul -> partial BN statistics only (no z to HBM) ---
    pstats = pl.pallas_call(
        conv_stats_kernel,
        grid=(G,),
        in_specs=[pl.BlockSpec((TM, Kpad), lambda i: (i, 0)), w_spec],
        out_specs=pl.BlockSpec((8, Cpad), lambda i: (i, 0)),
        out_shape=jax.ShapeDtypeStruct((8 * G, Cpad), jnp.float32),
        compiler_params=cparams,
    )(P, wf)

    # --- reduce partial stats; fold BN into a single scale/shift ---
    sums = pstats.reshape(G, 8, Cpad)[:, :2, :].sum(axis=0)      # (2, Cpad)
    inv_count = 1.0 / float(M)
    mean = sums[0] * inv_count
    # E[z^2] - E[z]^2 is safe here because the conv bias is dropped (z is near
    # zero-mean); switch to centered accumulation if a DC offset ever returns.
    var = jnp.maximum(sums[1] * inv_count - mean * mean, 0.0)
    gamma = jnp.pad(params["gamma"].reshape(-1), (0, Cpad - C3))
    beta = jnp.pad(params["beta"].reshape(-1), (0, Cpad - C3))
    scale = gamma * jax.lax.rsqrt(var + BN_EPS)
    shift = beta - mean * scale
    # (conv bias intentionally omitted: it cancels exactly under train-mode BN)

    # --- pass 2: recompute conv matmul, fused BN affine + ReLU, direct store ---
    out = pl.pallas_call(
        conv_bn_relu_kernel,
        grid=(G,),
        in_specs=[pl.BlockSpec((TM, Kpad), lambda i: (i, 0)), w_spec,
                  pl.BlockSpec((1, Cpad), lambda i: (0, 0)),
                  pl.BlockSpec((1, Cpad), lambda i: (0, 0))],
        out_specs=pl.BlockSpec((TM, Cpad), lambda i: (i, 0)),
        out_shape=jax.ShapeDtypeStruct((Mpad, Cpad), jnp.float32),
        compiler_params=cparams,
    )(P, wf, scale.reshape(1, Cpad), shift.reshape(1, Cpad))

    # Unpad + NHWC -> NCHW (module semantics require NCHW).  XLA fuses the
    # slice/reshape/transpose into a single copy; a consumer that accepts NHWC
    # could skip this entirely.
    out = out[:M, :C3].reshape(N, H, W, C3)
    return jnp.transpose(out, (0, 3, 1, 2))


# ---------------- parameter setup (plain JAX glue) ----------------

def spectral_normalize(w_oikk, key, n_iter=1, eps=1e-12):
    """PyTorch-style spectral norm: power iteration on the (Cout, Cin*K*K) view."""
    cout = w_oikk.shape[0]
    wm = w_oikk.reshape(cout, -1).astype(jnp.float32)
    u = jax.random.normal(key, (cout,), jnp.float32)
    u = u / (jnp.linalg.norm(u) + eps)
    v = None
    for _ in range(n_iter):
        v = wm.T @ u
        v = v / (jnp.linalg.norm(v) + eps)
        u = wm @ v
        u = u / (jnp.linalg.norm(u) + eps)
    sigma = u @ (wm @ v)
    return w_oikk / sigma


def make_params(key, in_channels, out_channels):
    ks = jax.random.split(key, 9)
    params = {}
    for i, K in enumerate((1, 3, 5)):
        w = 0.2 * jax.random.normal(ks[2 * i], (out_channels, in_channels, K, K),
                                    jnp.float32)
        w = spectral_normalize(w, ks[2 * i + 1])
        params[f"w{K}"] = jnp.transpose(w, (2, 3, 1, 0))   # (K, K, Cin, Cout) HWIO
    params["conv_bias"] = 0.1 * jax.random.normal(ks[6], (3, out_channels), jnp.float32)
    params["gamma"] = 1.0 + 0.1 * jax.random.normal(ks[7], (3, out_channels), jnp.float32)
    params["beta"] = 0.1 * jax.random.normal(ks[8], (3, out_channels), jnp.float32)
    return params


def reference_forward(x_nchw, params):
    """Pure-JAX reference matching the PyTorch forward (train-mode BN).

    The conv operands are rounded to bf16 (same MXU path as the kernel); BN is
    computed in f32.  The conv bias is included here — it cancels under
    train-mode BN, so the kernel (which drops it) must still match."""
    x = jnp.transpose(x_nchw, (0, 2, 3, 1))
    outs = []
    for bi, K in enumerate((1, 3, 5)):
        pad = K // 2
        z = jax.lax.conv_general_dilated(
            x.astype(jnp.bfloat16), params[f"w{K}"].astype(jnp.bfloat16),
            window_strides=(1, 1), padding=[(pad, pad), (pad, pad)],
            dimension_numbers=("NHWC", "HWIO", "NHWC"),
            preferred_element_type=jnp.float32)
        z = z + params["conv_bias"][bi]
        mean = jnp.mean(z, axis=(0, 1, 2))
        var = jnp.mean((z - mean) ** 2, axis=(0, 1, 2))
        y = params["gamma"][bi] * (z - mean) / jnp.sqrt(var + BN_EPS) + params["beta"][bi]
        outs.append(jnp.maximum(y, 0.0))
    return jnp.transpose(jnp.concatenate(outs, axis=-1), (0, 3, 1, 2))


if __name__ == "__main__":
    key = jax.random.PRNGKey(0)
    k_x, k_p = jax.random.split(key)

    N, Cin, H, W = 2, 4, 16, 16
    Cout = 8

    x = jax.random.normal(k_x, (N, Cin, H, W), jnp.float32)
    params = make_params(k_p, Cin, Cout)

    out = jax.block_until_ready(jax.jit(inception_block)(x, params))
    assert out.shape == (N, 3 * Cout, H, W), out.shape

    ref = jax.block_until_ready(reference_forward(x, params))
    np.testing.assert_allclose(np.asarray(out), np.asarray(ref), rtol=1e-3, atol=1e-3)

    print("KERNEL_OK")
</pallas_src>

<mosaic_0001>
module attributes {stable_mosaic.version = 11 : i64} {
  func.func @conv_stats_kernel(%arg0: i32, %arg1: memref<256x128xbf16, #tpu.memory_space<vmem>>, %arg2: memref<128x128xbf16, #tpu.memory_space<vmem>>, %arg3: memref<8x128xf32, #tpu.memory_space<vmem>>) attributes {dimension_semantics = [#tpu.dimension_semantics<parallel>], iteration_bounds = array<i64: 2>, scalar_prefetch = 0 : i64, scratch_operands = 0 : i64, tpu.core_type = #tpu.core_type<tc>, window_params = [{transform_indices = @transform_0, window_bounds = array<i64: 256, 128>}, {pipeline_mode = #tpu.pipeline_mode<synchronous>, transform_indices = @transform_1, window_bounds = array<i64: 128, 128>}, {transform_indices = @transform_2, window_bounds = array<i64: 8, 128>}]} {
    %c0 = arith.constant 0 : index
    %c0_0 = arith.constant 0 : index
    %0 = vector.load %arg1[%c0, %c0_0] : memref<256x128xbf16, #tpu.memory_space<vmem>>, vector<256x128xbf16>
    %c0_1 = arith.constant 0 : index
    %c0_2 = arith.constant 0 : index
    %1 = vector.load %arg2[%c0_1, %c0_2] : memref<128x128xbf16, #tpu.memory_space<vmem>>, vector<128x128xbf16>
    %cst = arith.constant dense<0.000000e+00> : vector<256x128xf32>
    %2 = tpu.matmul %0, %1, %cst {dimension_numbers = #tpu.dot_dimension_numbers<[1], [0], [0], [1], [0, 0, 1, 1], [], []>} : vector<256x128xbf16>, vector<128x128xbf16>, vector<256x128xf32> -> vector<256x128xf32>
    %cst_3 = arith.constant dense<0.000000e+00> : vector<128xf32>
    %3 = vector.multi_reduction <add>, %2, %cst_3 [0] : vector<256x128xf32> to vector<128xf32>
    %4 = vector.shape_cast %3 : vector<128xf32> to vector<1x128xf32>
    %5 = arith.mulf %2, %2 : vector<256x128xf32>
    %cst_4 = arith.constant dense<0.000000e+00> : vector<128xf32>
    %6 = vector.multi_reduction <add>, %5, %cst_4 [0] : vector<256x128xf32> to vector<128xf32>
    %7 = vector.shape_cast %6 : vector<128xf32> to vector<1x128xf32>
    %cst_5 = arith.constant 0.000000e+00 : f32
    %8 = vector.broadcast %cst_5 : f32 to vector<6x128xf32>
    %9 = tpu.concatenate %4, %7, %8 in 0 : vector<1x128xf32>, vector<1x128xf32>, vector<6x128xf32> -> vector<8x128xf32>
    %c0_6 = arith.constant 0 : index
    %c0_7 = arith.constant 0 : index
    %10 = vector.load %arg3[%c0_6, %c0_7] : memref<8x128xf32, #tpu.memory_space<vmem>>, vector<8x128xf32>
    tpu.vector_store %arg3[%c0_6, %c0_7], %9 {strides = array<i32>} : memref<8x128xf32, #tpu.memory_space<vmem>>, vector<8x128xf32>,
    return
  }
  func.func @transform_0(%arg0: i32) -> (i32, i32) {
    %c0_i32 = arith.constant 0 : i32
    %c0_i32_0 = arith.constant 0 : i32
    return %arg0, %c0_i32 : i32, i32
  }
  func.func @transform_1(%arg0: i32) -> (i32, i32) {
    %c0_i32 = arith.constant 0 : i32
    %c0_i32_0 = arith.constant 0 : i32
    %c0_i32_1 = arith.constant 0 : i32
    return %c0_i32, %c0_i32_0 : i32, i32
  }
  func.func @transform_2(%arg0: i32) -> (i32, i32) {
    %c0_i32 = arith.constant 0 : i32
    %c0_i32_0 = arith.constant 0 : i32
    return %arg0, %c0_i32 : i32, i32
  }
}

module attributes {stable_mosaic.version = 11 : i64} {
  func.func @conv_bn_relu_kernel(%arg0: i32, %arg1: memref<256x128xbf16, #tpu.memory_space<vmem>>, %arg2: memref<128x128xbf16, #tpu.memory_space<vmem>>, %arg3: memref<1x128xf32, #tpu.memory_space<vmem>>, %arg4: memref<1x128xf32, #tpu.memory_space<vmem>>, %arg5: memref<256x128xf32, #tpu.memory_space<vmem>>) attributes {dimension_semantics = [#tpu.dimension_semantics<parallel>], iteration_bounds = array<i64: 2>, scalar_prefetch = 0 : i64, scratch_operands = 0 : i64, tpu.core_type = #tpu.core_type<tc>, window_params = [{transform_indices = @transform_0, window_bounds = array<i64: 256, 128>}, {pipeline_mode = #tpu.pipeline_mode<synchronous>, transform_indices = @transform_1, window_bounds = array<i64: 128, 128>}, {pipeline_mode = #tpu.pipeline_mode<synchronous>, transform_indices = @transform_2, window_bounds = array<i64: 1, 128>}, {pipeline_mode = #tpu.pipeline_mode<synchronous>, transform_indices = @transform_3, window_bounds = array<i64: 1, 128>}, {transform_indices = @transform_4, window_bounds = array<i64: 256, 128>}]} {
    %c0 = arith.constant 0 : index
    %c0_0 = arith.constant 0 : index
    %0 = vector.load %arg1[%c0, %c0_0] : memref<256x128xbf16, #tpu.memory_space<vmem>>, vector<256x128xbf16>
    %c0_1 = arith.constant 0 : index
    %c0_2 = arith.constant 0 : index
    %1 = vector.load %arg2[%c0_1, %c0_2] : memref<128x128xbf16, #tpu.memory_space<vmem>>, vector<128x128xbf16>
    %cst = arith.constant dense<0.000000e+00> : vector<256x128xf32>
    %2 = tpu.matmul %0, %1, %cst {dimension_numbers = #tpu.dot_dimension_numbers<[1], [0], [0], [1], [0, 0, 1, 1], [], []>} : vector<256x128xbf16>, vector<128x128xbf16>, vector<256x128xf32> -> vector<256x128xf32>
    %c0_3 = arith.constant 0 : index
    %c0_4 = arith.constant 0 : index
    %3 = vector.load %arg3[%c0_3, %c0_4] : memref<1x128xf32, #tpu.memory_space<vmem>>, vector<1x128xf32>
    %4 = vector.broadcast %3 : vector<1x128xf32> to vector<256x128xf32>
    %5 = arith.mulf %2, %4 : vector<256x128xf32>
    %c0_5 = arith.constant 0 : index
    %c0_6 = arith.constant 0 : index
    %6 = vector.load %arg4[%c0_5, %c0_6] : memref<1x128xf32, #tpu.memory_space<vmem>>, vector<1x128xf32>
    %7 = vector.broadcast %6 : vector<1x128xf32> to vector<256x128xf32>
    %8 = arith.addf %5, %7 : vector<256x128xf32>
    %cst_7 = arith.constant 0.000000e+00 : f32
    %9 = vector.broadcast %cst_7 : f32 to vector<256x128xf32>
    %10 = arith.maximumf %8, %9 : vector<256x128xf32>
    %c0_8 = arith.constant 0 : index
    %c0_9 = arith.constant 0 : index
    %11 = vector.load %arg5[%c0_8, %c0_9] : memref<256x128xf32, #tpu.memory_space<vmem>>, vector<256x128xf32>
    tpu.vector_store %arg5[%c0_8, %c0_9], %10 {strides = array<i32>} : memref<256x128xf32, #tpu.memory_space<vmem>>, vector<256x128xf32>,
    return
  }
  func.func @transform_0(%arg0: i32) -> (i32, i32) {
    %c0_i32 = arith.constant 0 : i32
    %c0_i32_0 = arith.constant 0 : i32
    return %arg0, %c0_i32 : i32, i32
  }
  func.func @transform_1(%arg0: i32) -> (i32, i32) {
    %c0_i32 = arith.constant 0 : i32
    %c0_i32_0 = arith.constant 0 : i32
    %c0_i32_1 = arith.constant 0 : i32
    return %c0_i32, %c0_i32_0 : i32, i32
  }
  func.func @transform_2(%arg0: i32) -> (i32, i32) {
    %c0_i32 = arith.constant 0 : i32
    %c0_i32_0 = arith.constant 0 : i32
    %c0_i32_1 = arith.constant 0 : i32
    return %c0_i32, %c0_i32_0 : i32, i32
  }
  func.func @transform_3(%arg0: i32) -> (i32, i32) {
    %c0_i32 = arith.constant 0 : i32
    %c0_i32_0 = arith.constant 0 : i32
    %c0_i32_1 = arith.constant 0 : i32
    return %c0_i32, %c0_i32_0 : i32, i32
  }
  func.func @transform_4(%arg0: i32) -> (i32, i32) {
    %c0_i32 = arith.constant 0 : i32
    %c0_i32_0 = arith.constant 0 : i32
    return %arg0, %c0_i32 : i32, i32
  }
}

</mosaic_0001>

<bundles_post_ra>
// kernel: inception_block.2
= control target key start
LH: loop header
LB: loop body
LE: loop exit
PB: predicated region body
PF: predicated region fallthrough
CT: control target
= control target key end

     0   :  { %s839_s9 = smov 0   ;;  %s923_s0 = inlined_call_operand.vmem [shape: bf16[512,128], index: 0, kind: input, shape index: {}]   ;;  %s924_s1 = inlined_call_operand.vmem [shape: bf16[128,128], index: 1, kind: input, shape index: {}]   ;;  %s925_s2 = inlined_call_operand.vmem [shape: f32[16,128], index: 2, kind: output, shape index: {}]  }
   0x1 LB: > { %s845_s10 = sadd.s32 4294967295, %s822_s9   ;;  %p666_p0 = scmp.ge.s32.totalorder %s822_s9, 1  ;;  %s822_s9 = sphi %s839_s9, %s12_s9  }
   0x2   : > { %p113_p1 = scmp.lt.s32.totalorder %s822_s9, 3 }
   0x4   : > { %p114_p2 = pnand %p666_p0, %p113_p1 }
   0x5   : > { %s667_s13 = sshll.u32 (!%p114_p2), %s845_s10, 5  ;;  %p140_p4 = scmp.lt.s32.totalorder (!%p114_p2), %s845_s10, 1 }
   0x6   : > { %117 = sbr.rel (%p114_p2) target bundleno = 322 (0x142), region = 28  ;;  %p135_p3 = scmp.lt.s32.totalorder (!%p114_p2), %s667_s13, 63 }
   0xb   : > { %v792_v0 = vld [vmem:[%s924_s1 + $0x38] sm:$0xff]   ;;  %v793_v1 = vld [vmem:[%s924_s1 + $0x30] sm:$0xff]   ;;  %s927_s13 = smov (!%p135_p3, %s667_s13), 63  ;;  %v794_v2 = vld [vmem:[%s924_s1 + $0x28] sm:$0xff]   ;;  %s929_s10 = smov (!%p140_p4, %s845_s10), 1  ;;  %vm604_vm0 = vcmask 1040384  }
   0xc   : > { %720 = vmatprep.subr.bf16.mxu0 %v792_v0  ;;  %768 = vmatprep.subr.bf16.mxu1 %v792_v0  ;;  %s668_s18 = sshll.u32 %s927_s13, 2  ;;  %v795_v3 = vld [vmem:[%s924_s1 + $0x20] sm:$0xff]   ;;  %v796_v5 = vld [vmem:[%s924_s1 + $0x18] sm:$0xff]   ;;  %v797_v6 = vld [vmem:[%s924_s1 + $0x10] sm:$0xff]   ;;  %s669_s4 = sshll.u32 %s929_s10, 3  ;;  %vm606_vm1 = vcmask 1041408  }
   0xd   : > { %721 = vmatpush3.bf16.msra.mxu0 %v792_v0  ;;  %776 = vmatpush3.bf16.msra.mxu1 %v792_v0  ;;  %s862_s21 = scalar_lea.vmem %s923_s0, %s668_s18  ;;  %v798_v8 = vld [vmem:[%s924_s1 + $0x8] sm:$0xff]   ;;  %v799_v9 = vld [vmem:[%s924_s1] sm:$0xff]   ;;  %s143_s7 = scalar_lea.vmem %s925_s2, %s669_s4 }
   0xe   : > { %722 = vmatprep.subr.bf16.mxu0 %v793_v1  ;;  %769 = vmatprep.subr.bf16.mxu1 %v793_v1  ;;  %v800_v4 = vld [vmem:[%s862_s21] sm:$0xff]   ;;  %v801_v10 = vld [vmem:[%s862_s21 + $0x8] sm:$0xff]   ;;  %v802_v12 = vld [vmem:[%s862_s21 + $0x10] sm:$0xff]  }
   0xf   : > { %736 = vmatprep.mubr.bf16.mxu0 %v800_v4  ;;  %v808_v7 = vld [vmem:[%s862_s21 + $0x40] sm:$0xff]   ;;  %v809_v11 = vld [vmem:[%s862_s21 + $0x48] sm:$0xff]   ;;  %v810_v13 = vld [vmem:[%s862_s21 + $0x50] sm:$0xff]  }
  0x10   : > { %752 = vmatprep.mubr.bf16.mxu1 %v808_v7  ;;  %v803_v14 = vld [vmem:[%s862_s21 + $0x18] sm:$0xff]   ;;  %v804_v16 = vld [vmem:[%s862_s21 + $0x20] sm:$0xff]   ;;  %v805_v18 = vld [vmem:[%s862_s21 + $0x28] sm:$0xff]  }
  0x11   : > { %723 = vmatpush3.bf16.msra.mxu0 %v793_v1  ;;  %777 = vmatpush3.bf16.msra.mxu1 %v793_v1  ;;  %v811_v15 = vld [vmem:[%s862_s21 + $0x58] sm:$0xff]   ;;  %v812_v17 = vld [vmem:[%s862_s21 + $0x60] sm:$0xff]   ;;  %v813_v19 = vld [vmem:[%s862_s21 + $0x68] sm:$0xff]  }
  0x12   : > { %724 = vmatprep.subr.bf16.mxu0 %v794_v2  ;;  %770 = vmatprep.subr.bf16.mxu1 %v794_v2  ;;  %v806_v20 = vld [vmem:[%s862_s21 + $0x30] sm:$0xff]   ;;  %v807_v22 = vld [vmem:[%s862_s21 + $0x38] sm:$0xff]  }
  0x13   : > { %v814_v21 = vld [vmem:[%s862_s21 + $0x70] sm:$0xff]   ;;  %v815_v23 = vld [vmem:[%s862_s21 + $0x78] sm:$0xff]  }
  0x15   : > { %725 = vmatpush3.bf16.msra.mxu0 %v794_v2  ;;  %778 = vmatpush3.bf16.msra.mxu1 %v794_v2 }
  0x16   : > { %726 = vmatprep.subr.bf16.mxu0 %v795_v3  ;;  %771 = vmatprep.subr.bf16.mxu1 %v795_v3 }
  0x19   : > { %727 = vmatpush3.bf16.msra.mxu0 %v795_v3  ;;  %779 = vmatpush3.bf16.msra.mxu1 %v795_v3 }
  0x1a   : > { %728 = vmatprep.subr.bf16.mxu0 %v796_v5  ;;  %772 = vmatprep.subr.bf16.mxu1 %v796_v5 }
  0x1d   : > { %729 = vmatpush3.bf16.msra.mxu0 %v796_v5  ;;  %780 = vmatpush3.bf16.msra.mxu1 %v796_v5 }
  0x1e   : > { %730 = vmatprep.subr.bf16.mxu0 %v797_v6  ;;  %773 = vmatprep.subr.bf16.mxu1 %v797_v6 }
  0x21   : > { %731 = vmatpush3.bf16.msra.mxu0 %v797_v6  ;;  %781 = vmatpush3.bf16.msra.mxu1 %v797_v6 }
  0x22   : > { %732 = vmatprep.subr.bf16.mxu0 %v798_v8  ;;  %774 = vmatprep.subr.bf16.mxu1 %v798_v8 }
  0x25   : > { %733 = vmatpush3.bf16.msra.mxu0 %v798_v8  ;;  %782 = vmatpush3.bf16.msra.mxu1 %v798_v8 }
  0x26   : > { %734 = vmatprep.subr.bf16.mxu0 %v799_v9  ;;  %775 = vmatprep.subr.bf16.mxu1 %v799_v9 }
  0x29   : > { %735 = vmatpush3.bf16.msra.mxu0 %v799_v9  ;;  %783 = vmatpush3.bf16.msra.mxu1 %v799_v9 }
  0x2c   : > { %737 = vmatmul.mubr.bf16.vlgmr.msra.gmra.mxu0 %v801_v10  ;;  %753 = vmatmul.mubr.bf16.vlgmr.msra.gmra.mxu1 %v809_v11 }
  0x2d   : > { %740 = vmatprep.mubr.bf16.mxu0 %v802_v12  ;;  %756 = vmatprep.mubr.bf16.mxu1 %v810_v13 }
  0x34   : > { %741 = vmatmul.mubr.bf16.gmra.mxu0 %v803_v14  ;;  %757 = vmatmul.mubr.bf16.gmra.mxu1 %v811_v15 }
  0x35   : > { %744 = vmatprep.mubr.bf16.mxu0 %v804_v16  ;;  %760 = vmatprep.mubr.bf16.mxu1 %v812_v17 }
  0x3c   : > { %745 = vmatmul.mubr.bf16.gmra.mxu0 %v805_v18  ;;  %761 = vmatmul.mubr.bf16.gmra.mxu1 %v813_v19 }
  0x3d   : > { %748 = vmatprep.mubr.bf16.mxu0 %v806_v20  ;;  %764 = vmatprep.mubr.bf16.mxu1 %v814_v21 }
  0x44   : > { %749 = vmatmul.mubr.bf16.gmra.mxu0 %v807_v22  ;;  %765 = vmatmul.mubr.bf16.gmra.mxu1 %v815_v23 }
  0xec   : > { %v738_v24 = vpop.f32.mrf.mxu0  ;;  %v895_v25 = vpop.f32.mrf.mxu1 }
  0xed   : > { %v537_v35 = vmul.f32 %v738_v24, %v738_v24 }
  0xee   : > { %v371_v26 = vpop.f32.mrf.mxu0  ;;  %v897_v28 = vpop.f32.mrf.mxu1 }
  0xef   : > { %v535_v30 = vmul.f32 %v371_v26, %v371_v26 }
  0xf0   : > { %v739_v27 = vpop.f32.mrf.mxu0  ;;  %v899_v34 = vpop.f32.mrf.mxu1 }
  0xf1   : > { %v538_v39 = vmul.f32 %v739_v27, %v739_v27 }
  0xf2   : > { %v374_v29 = vpop.f32.mrf.mxu0  ;;  %v438_v43 = vpop.f32.mrf.mxu1 }
  0xf3   : > { %v498_v31 = vadd.f32 %v374_v29, %v371_v26  ;;  %v536_v32 = vmul.f32 %v374_v29, %v374_v29 }
  0xf4   : > { %v742_v33 = vpop.f32.mrf.mxu0  ;;  %v901_v52 = vpop.f32.mrf.mxu1 }
  0xf5   : > { %v499_v36 = vadd.f32 %v738_v24, %v498_v31  ;;  %v567_v37 = vadd.f32 %v536_v32, %v535_v30  ;;  %v541_v53 = vmul.f32 %v742_v33, %v742_v33 }
  0xf6   : > { %v387_v38 = vpop.f32.mrf.mxu0  ;;  %v451_v61 = vpop.f32.mrf.mxu1 }
  0xf7   : > { %v568_v40 = vadd.f32 %v567_v37, %v537_v35  ;;  %v500_v41 = vadd.f32 %v739_v27, %v499_v36  ;;  %v539_v45 = vmul.f32 %v387_v38, %v387_v38 }
  0xf8   : > { %v743_v42 = vpop.f32.mrf.mxu0  ;;  %v759_v6 = vpop.f32.mrf.mxu1 }
  0xf9   : > { %v501_v44 = vadd.f32 %v500_v41, %v387_v38  ;;  %v569_v46 = vadd.f32 %v568_v40, %v538_v39  ;;  %v542_v57 = vmul.f32 %v743_v42, %v743_v42  ;;  %v552_v38 = vmul.f32 %v438_v43, %v438_v43 }
  0xfa   : > { %v390_v47 = vpop.f32.mrf.mxu0  ;;  %v454_v15 = vpop.f32.mrf.mxu1  ;;  %v553_v41 = vmul.f32 %v895_v25, %v895_v25 }
  0xfb   : > { %v570_v48 = vadd.f32 %v569_v46, %v539_v45  ;;  %v502_v49 = vadd.f32 %v501_v44, %v390_v47  ;;  %v540_v50 = vmul.f32 %v390_v47, %v390_v47  ;;  %v554_v45 = vmul.f32 %v899_v34, %v899_v34 }
  0xfc   : > { %v746_v51 = vpop.f32.mrf.mxu0  ;;  %v762_v23 = vpop.f32.mrf.mxu1 }
  0xfd   : > { %v503_v54 = vadd.f32 %v742_v33, %v502_v49  ;;  %v571_v55 = vadd.f32 %v570_v48, %v540_v50  ;;  %v545_v7 = vmul.f32 %v746_v51, %v746_v51  ;;  %v551_v33 = vmul.f32 %v897_v28, %v897_v28 }
  0xfe   : > { %v403_v56 = vpop.f32.mrf.mxu0  ;;  %v467_v32 = vpop.f32.mrf.mxu1  ;;  %v555_v50 = vmul.f32 %v451_v61, %v451_v61 }
  0xff   : > { %v572_v58 = vadd.f32 %v571_v55, %v541_v53  ;;  %v504_v59 = vadd.f32 %v743_v42, %v503_v54  ;;  %v543_v63 = vmul.f32 %v403_v56, %v403_v56  ;;  %v556_v53 = vmul.f32 %v454_v15, %v454_v15 }
 0x100   : > { %v747_v60 = vpop.f32.mrf.mxu0  ;;  %v763_v40 = vpop.f32.mrf.mxu1  ;;  %v557_v55 = vmul.f32 %v901_v52, %v901_v52 }
 0x101   : > { %v505_v62 = vadd.f32 %v504_v59, %v403_v56  ;;  %v573_v0 = vadd.f32 %v572_v58, %v542_v57  ;;  %v546_v11 = vmul.f32 %v747_v60, %v747_v60  ;;  %v558_v57 = vmul.f32 %v759_v6, %v759_v6 }
 0x102   : > { %v406_v1 = vpop.f32.mrf.mxu0  ;;  %v470_v48 = vpop.f32.mrf.mxu1 }
 0x103   : > { %v574_v2 = vadd.f32 %v573_v0, %v543_v63  ;;  %v506_v3 = vadd.f32 %v505_v62, %v406_v1  ;;  %v544_v4 = vmul.f32 %v406_v1, %v406_v1  ;;  %v560_v1 = vmul.f32 %v470_v48, %v470_v48 }
 0x104   : > { %v750_v5 = vpop.f32.mrf.mxu0  ;;  %v766_v54 = vpop.f32.mrf.mxu1 }
 0x105   : > { %v507_v8 = vadd.f32 %v746_v51, %v506_v3  ;;  %v575_v9 = vadd.f32 %v574_v2, %v544_v4  ;;  %v549_v24 = vmul.f32 %v750_v5, %v750_v5  ;;  %v561_v3 = vmul.f32 %v762_v23, %v762_v23 }
 0x106   : > { %v419_v10 = vpop.f32.mrf.mxu0 }
 0x107   : > { %v576_v12 = vadd.f32 %v575_v9, %v545_v7  ;;  %v508_v13 = vadd.f32 %v747_v60, %v507_v8  ;;  %v547_v17 = vmul.f32 %v419_v10, %v419_v10  ;;  %v483_v60 = vpop.f32.mrf.mxu1  ;;  %v562_v7 = vmul.f32 %v763_v40, %v763_v40 }
 0x108   : > { %v751_v14 = vpop.f32.mrf.mxu0 }
 0x109   : > { %v509_v16 = vadd.f32 %v508_v13, %v419_v10  ;;  %v577_v18 = vadd.f32 %v576_v12, %v546_v11  ;;  %v550_v29 = vmul.f32 %v751_v14, %v751_v14  ;;  %v767_v2 = vpop.f32.mrf.mxu1  ;;  %v563_v11 = vmul.f32 %v483_v60, %v483_v60 }
 0x10a   : > { %v422_v19 = vpop.f32.mrf.mxu0 }
 0x10b   : > { %v578_v20 = vadd.f32 %v577_v18, %v547_v17  ;;  %v510_v21 = vadd.f32 %v509_v16, %v422_v19  ;;  %v548_v22 = vmul.f32 %v422_v19, %v422_v19  ;;  %v566_v18 = vmul.f32 %v767_v2, %v767_v2 }
 0x10d   : > { %v511_v26 = vadd.f32 %v750_v5, %v510_v21  ;;  %v579_v27 = vadd.f32 %v578_v20, %v548_v22 }
 0x10f   : > { %v512_v30 = vadd.f32 %v751_v14, %v511_v26  ;;  %v580_v31 = vadd.f32 %v579_v27, %v549_v24 }
 0x111   : > { %v581_v35 = vadd.f32 %v580_v31, %v550_v29  ;;  %v513_v36 = vadd.f32 %v512_v30, %v897_v28 }
 0x113   : > { %v514_v37 = vadd.f32 %v513_v36, %v438_v43  ;;  %v582_v39 = vadd.f32 %v581_v35, %v551_v33 }
 0x115   : > { %v515_v42 = vadd.f32 %v895_v25, %v514_v37  ;;  %v583_v44 = vadd.f32 %v582_v39, %v552_v38 }
 0x117   : > { %v584_v46 = vadd.f32 %v583_v44, %v553_v41  ;;  %v516_v47 = vadd.f32 %v899_v34, %v515_v42  ;;  %v559_v34 = vmul.f32 %v467_v32, %v467_v32 }
 0x119   : > { %v517_v49 = vadd.f32 %v516_v47, %v451_v61  ;;  %v585_v28 = vadd.f32 %v584_v46, %v554_v45 }
 0x11b   : > { %v586_v51 = vadd.f32 %v585_v28, %v555_v50  ;;  %v518_v43 = vadd.f32 %v517_v49, %v454_v15  ;;  %v565_v15 = vmul.f32 %v766_v54, %v766_v54 }
 0x11d   : > { %v519_v25 = vadd.f32 %v901_v52, %v518_v43  ;;  %v587_v56 = vadd.f32 %v586_v51, %v556_v53  ;;  %v486_v52 = vpop.f32.mrf.mxu1 }
 0x11e   : > { %v564_v14 = vmul.f32 %v486_v52, %v486_v52 }
 0x11f   : > { %v588_v58 = vadd.f32 %v587_v56, %v557_v55  ;;  %v520_v59 = vadd.f32 %v759_v6, %v519_v25 }
 0x121   : > { %v521_v62 = vadd.f32 %v520_v59, %v467_v32  ;;  %v589_v63 = vadd.f32 %v588_v58, %v558_v57 }
 0x123   : > { %v590_v0 = vadd.f32 %v589_v63, %v559_v34  ;;  %v522_v61 = vadd.f32 %v521_v62, %v470_v48 }
 0x125   : > { %v523_v4 = vadd.f32 %v762_v23, %v522_v61  ;;  %v591_v5 = vadd.f32 %v590_v0, %v560_v1 }
 0x127   : > { %v592_v8 = vadd.f32 %v591_v5, %v561_v3  ;;  %v524_v9 = vadd.f32 %v763_v40, %v523_v4 }
 0x129   : > { %v525_v10 = vadd.f32 %v524_v9, %v483_v60  ;;  %v593_v12 = vadd.f32 %v592_v8, %v562_v7 }
 0x12b   : > { %v594_v6 = vadd.f32 %v593_v12, %v563_v11  ;;  %v526_v13 = vadd.f32 %v525_v10, %v486_v52 }
 0x12d   : > { %v527_v16 = vadd.f32 %v766_v54, %v526_v13  ;;  %v595_v17 = vadd.f32 %v594_v6, %v564_v14 }
 0x12f   : > { %v528_v19 = vadd.f32 %v767_v2, %v527_v16  ;;  %v596_v20 = vadd.f32 %v595_v17, %v565_v15 }
 0x131   : > { %v529_v21 = vrot.slane %v528_v19, 4  ;;  %v597_v22 = vadd.f32 %v596_v20, %v566_v18 }
 0x133   : > { %v530_v23 = vadd.f32 %v529_v21, %v528_v19  ;;  %v598_v24 = vrot.slane %v597_v22, 4 }
 0x135   : > { %v531_v26 = vrot.slane %v530_v23, 2  ;;  %v599_v27 = vadd.f32 %v598_v24, %v597_v22 }
 0x137   : > { %v532_v29 = vadd.f32 %v531_v26, %v530_v23  ;;  %v600_v30 = vrot.slane %v599_v27, 2 }
 0x139   : > { %v533_v31 = vrot.slane %v532_v29, 1  ;;  %v601_v32 = vadd.f32 %v600_v30, %v599_v27 }
 0x13b   : > { %v602_v33 = vrot.slane %v601_v32, 1  ;;  %v534_v35 = vadd.f32 %v533_v31, %v532_v29 }
 0x13d   : > { %v603_v36 = vadd.f32 %v602_v33, %v601_v32 }
 0x13f   : > { %v605_v37 = vsel %vm604_vm0, %v534_v35, %v603_v36 }
 0x140   : > { %v607_v38 = vsel %vm606_vm1, %v605_v37, 0.0 }
 0x141   : > { %608 = vst [vmem:[%s143_s7] sm:$0xff] %v607_v38 }
 0x142 PF: > { %s12_s9 = sadd.s32 1, %s822_s9  }
 0x143   : > { %p9_p5 = scmp.ge.s32.totalorder %s12_s9, 4  }
 0x145   :  { %11 = sbr.rel (!%p9_p5) target bundleno = 1 (0x1), region = 58 }

// kernel: inception_block.3
= control target key start
LH: loop header
LB: loop body
LE: loop exit
PB: predicated region body
PF: predicated region fallthrough
CT: control target
= control target key end

     0   :  { %9 = vsyncpa [#allocation3], 0  ;;  %s1309_s0 = inlined_call_operand.vmem [shape: bf16[512,128], index: 0, kind: input, shape index: {}]   ;;  %s1310_s1 = inlined_call_operand.vmem [shape: bf16[128,128], index: 1, kind: input, shape index: {}]   ;;  %s1311_s2 = inlined_call_operand.vmem [shape: f32[1,128], index: 2, kind: input, shape index: {}]   ;;  %s1312_s3 = inlined_call_operand.vmem [shape: f32[1,128], index: 3, kind: input, shape index: {}]   ;;  %s1313_s4 = inlined_call_operand.hbm [shape: f32[512,128], index: 4, kind: output, shape index: {}]  }
   0x1   :  { %11 = vsyncpa [#allocation3 + $0x1], 0  ;;  %s1053_s15 = smov 0   ;;  %s1055_s16 = smov 0  }
   0x2   :  { %s1057_s17 = smov 0   ;;  %s1059_s18 = smov 0  }
   0x3 LB: > { %s1074_s19 = sadd.s32 4294967295, %s1023_s18   ;;  %s771_s20 = sadd.s32 4294967294, %s1023_s18   ;;  %s1023_s18 = sphi %s1059_s18, %s1319_s18   ;;  %s1019_s17 = sphi %s1057_s17, %s1318_s17   ;;  %s1015_s16 = sphi %s1055_s16, %s1317_s16   ;;  %s1011_s15 = sphi %s1053_s15, %s1316_s15  }
   0x4   : > { %s1078_s21 = sadd.s32 1, %s1023_s18   ;;  %s113_s22 = sadd.s32 1, %s1019_s17 }
   0x5   : > { %s110_s23 = ssub.s32 %s1023_s18, %s1078_s21  ;;  %p123_p0 = scmp.ne.s32.totalorder %s1019_s17, %s1015_s16 }
   0x6   : > { %p111_p1 = scmp.eq.s32.totalorder %s110_s23, 0  ;;  %p124_p2 = scmp.eq.s32.totalorder %s1074_s19, 1 }
   0x7   : > { %p129_p3 = scmp.ne.s32.totalorder %s1015_s16, %s1011_s15  ;;  %p130_p4 = scmp.eq.s32.totalorder %s771_s20, 1 }
   0x8   : > { %s1089_s24 = scalar_select %p111_p1, %s1019_s17, %s113_s22  }
   0x9   : > { %p1091_p5 = por %p124_p2, %p123_p0  ;;  %p1095_p6 = por %p130_p4, %p129_p3 }
   0xa   : > { %p774_p7 = scmp.ge.s32.totalorder %s1023_s18, 1  ;;  %p166_p8 = scmp.lt.s32.totalorder %s1023_s18, 3 }
   0xc   : > { %p167_p9 = pnand %p774_p7, %p166_p8 }
   0xd   : > { %s776_s29 = sshll.u32 (!%p167_p9), %s1074_s19, 5  ;;  %s189_s5 = sand.u32 (!%p167_p9), 1, %s1015_s16  }
   0xe   : > { %170 = sbr.rel (%p167_p9) target bundleno = 295 (0x127), region = 36  ;;  %p193_p10 = scmp.lt.s32.totalorder (!%p167_p9), %s776_s29, 63 }
   0xf   : > { %s775_s10 = sshll.u32 (!%p167_p9), %s189_s5, 8  ;;  %s809_s12 = sshll.u32 (!%p167_p9), %s1074_s19, 12 }
  0x10   : > { %s1259_s19 = scalar_lea.hbm (!%p167_p9), %s1313_s4, %s809_s12  ;;  %s1269_s22 = scalar_lea.sflag (!%p167_p9), [#allocation3], %s189_s5 }
  0x11   : > { %s1025_s27 = smov (!%p167_p9), [#allocation2]  }
  0x12   : > { %s967_s28 = sshll.u32 (!%p167_p9), %s1025_s27, 4  ;;  %s968_s28 = int_to_ptr.vmem [resolvable:$false] %s967_s28 }
  0x13   : > { %v939_v0 = vld [vmem:[%s1310_s1 + $0x38] sm:$0xff]   ;;  %v940_v1 = vld [vmem:[%s1310_s1 + $0x30] sm:$0xff]   ;;  %s1321_s29 = smov (!%p193_p10, %s776_s29), 63  ;;  %v941_v2 = vld [vmem:[%s1310_s1 + $0x28] sm:$0xff]  }
  0x14   : > { %834 = vmatprep.subr.bf16.mxu0 %v939_v0  ;;  %882 = vmatprep.subr.bf16.mxu1 %v939_v0  ;;  %s777_s8 = sshll.u32 %s1321_s29, 2  ;;  %v942_v3 = vld [vmem:[%s1310_s1 + $0x20] sm:$0xff]   ;;  %v943_v6 = vld [vmem:[%s1310_s1 + $0x18] sm:$0xff]   ;;  %v944_v7 = vld [vmem:[%s1310_s1 + $0x10] sm:$0xff]   ;;  %s969_s29 = scalar_lea.vmem %s968_s28, 8192 }
  0x15   : > { %835 = vmatpush3.bf16.msra.mxu0 %v939_v0  ;;  %890 = vmatpush3.bf16.msra.mxu1 %v939_v0  ;;  %s1114_s11 = scalar_lea.vmem %s1309_s0, %s777_s8  ;;  %v945_v8 = vld [vmem:[%s1310_s1 + $0x8] sm:$0xff]   ;;  %v946_v9 = vld [vmem:[%s1310_s1] sm:$0xff]  }
  0x16   : > { %836 = vmatprep.subr.bf16.mxu0 %v940_v1  ;;  %883 = vmatprep.subr.bf16.mxu1 %v940_v1  ;;  %v947_v4 = vld [vmem:[%s1114_s11] sm:$0xff]   ;;  %v949_v10 = vld [vmem:[%s1114_s11 + $0x8] sm:$0xff]   ;;  %v951_v12 = vld [vmem:[%s1114_s11 + $0x10] sm:$0xff]  }
  0x17   : > { %v948_v5 = vld [vmem:[%s1114_s11 + $0x40] sm:$0xff]   ;;  %850 = vmatprep.mubr.bf16.mxu0 %v947_v4  ;;  %v950_v11 = vld [vmem:[%s1114_s11 + $0x48] sm:$0xff]   ;;  %v952_v13 = vld [vmem:[%s1114_s11 + $0x50] sm:$0xff]  }
  0x18   : > { %866 = vmatprep.mubr.bf16.mxu1 %v948_v5  ;;  %v953_v14 = vld [vmem:[%s1114_s11 + $0x18] sm:$0xff]   ;;  %v955_v16 = vld [vmem:[%s1114_s11 + $0x20] sm:$0xff]   ;;  %v957_v18 = vld [vmem:[%s1114_s11 + $0x28] sm:$0xff]  }
  0x19   : > { %837 = vmatpush3.bf16.msra.mxu0 %v940_v1  ;;  %891 = vmatpush3.bf16.msra.mxu1 %v940_v1  ;;  %v954_v15 = vld [vmem:[%s1114_s11 + $0x58] sm:$0xff]   ;;  %v956_v17 = vld [vmem:[%s1114_s11 + $0x60] sm:$0xff]   ;;  %v958_v19 = vld [vmem:[%s1114_s11 + $0x68] sm:$0xff]  }
  0x1a   : > { %838 = vmatprep.subr.bf16.mxu0 %v941_v2  ;;  %884 = vmatprep.subr.bf16.mxu1 %v941_v2  ;;  %v959_v20 = vld [vmem:[%s1114_s11 + $0x30] sm:$0xff]   ;;  %v961_v22 = vld [vmem:[%s1114_s11 + $0x38] sm:$0xff]   ;;  %v1151_v24 = vld [vmem:[%s1311_s2] ss:$0 sm:$0xff] }
  0x1b   : > { %v960_v21 = vld [vmem:[%s1114_s11 + $0x70] sm:$0xff]   ;;  %v962_v23 = vld [vmem:[%s1114_s11 + $0x78] sm:$0xff]   ;;  %v1156_v26 = vld [vmem:[%s1312_s3] ss:$0 sm:$0xff]  ;;  %s1170_s11 = scalar_lea.vmem [#allocation2], %s775_s10 }
  0x1c   : > { %s709_s13 = sshll.u32 %s1170_s11, 4  ;;  %s1261_s13 = int_to_ptr.vmem [resolvable:$true] %s709_s13 }
  0x1d   : > { %839 = vmatpush3.bf16.msra.mxu0 %v941_v2  ;;  %892 = vmatpush3.bf16.msra.mxu1 %v941_v2  ;;  %s963_s23 = scalar_lea.vmem %s1261_s13, 4096  ;;  %p970_p0 = scmp.lt.s32.totalorder %s1261_s13, %s968_s28 }
  0x1e   : > { %840 = vmatprep.subr.bf16.mxu0 %v942_v3  ;;  %885 = vmatprep.subr.bf16.mxu1 %v942_v3  ;;  %p964_p11 = scmp.ne.s32.totalorder %s1261_s13, %s963_s23  ;;  %p971_p1 = scmp.lt.s32.totalorder %s969_s29, %s963_s23 }
  0x20   : > { %p965_p12 = pnand %p964_p11, %p1091_p5  ;;  %p972_p2 = por %p971_p1, %p970_p0 }
  0x21   : > { %841 = vmatpush3.bf16.msra.mxu0 %v942_v3  ;;  %893 = vmatpush3.bf16.msra.mxu1 %v942_v3 }
  0x22   : > { %842 = vmatprep.subr.bf16.mxu0 %v943_v6  ;;  %886 = vmatprep.subr.bf16.mxu1 %v943_v6  ;;  %p966_p13 = pneg %p965_p12 }
  0x24   : > { %p973_p3 = pnand %p972_p2, %p966_p13 }
  0x25   : > { %843 = vmatpush3.bf16.msra.mxu0 %v943_v6  ;;  %894 = vmatpush3.bf16.msra.mxu1 %v943_v6 }
  0x26   : > { %844 = vmatprep.subr.bf16.mxu0 %v944_v7  ;;  %887 = vmatprep.subr.bf16.mxu1 %v944_v7 }
  0x29   : > { %845 = vmatpush3.bf16.msra.mxu0 %v944_v7  ;;  %895 = vmatpush3.bf16.msra.mxu1 %v944_v7 }
  0x2a   : > { %846 = vmatprep.subr.bf16.mxu0 %v945_v8  ;;  %888 = vmatprep.subr.bf16.mxu1 %v945_v8 }
  0x2d   : > { %847 = vmatpush3.bf16.msra.mxu0 %v945_v8  ;;  %896 = vmatpush3.bf16.msra.mxu1 %v945_v8 }
  0x2e   : > { %848 = vmatprep.subr.bf16.mxu0 %v946_v9  ;;  %889 = vmatprep.subr.bf16.mxu1 %v946_v9 }
  0x31   : > { %849 = vmatpush3.bf16.msra.mxu0 %v946_v9  ;;  %897 = vmatpush3.bf16.msra.mxu1 %v946_v9 }
  0x34   : > { %851 = vmatmul.mubr.bf16.vlgmr.msra.gmra.mxu0 %v949_v10  ;;  %867 = vmatmul.mubr.bf16.vlgmr.msra.gmra.mxu1 %v950_v11 }
  0x35   : > { %854 = vmatprep.mubr.bf16.mxu0 %v951_v12  ;;  %870 = vmatprep.mubr.bf16.mxu1 %v952_v13 }
  0x3c   : > { %855 = vmatmul.mubr.bf16.gmra.mxu0 %v953_v14  ;;  %871 = vmatmul.mubr.bf16.gmra.mxu1 %v954_v15 }
  0x3d   : > { %858 = vmatprep.mubr.bf16.mxu0 %v955_v16  ;;  %874 = vmatprep.mubr.bf16.mxu1 %v956_v17 }
  0x44   : > { %859 = vmatmul.mubr.bf16.gmra.mxu0 %v957_v18  ;;  %875 = vmatmul.mubr.bf16.gmra.mxu1 %v958_v19 }
  0x45   : > { %862 = vmatprep.mubr.bf16.mxu0 %v959_v20  ;;  %878 = vmatprep.mubr.bf16.mxu1 %v960_v21 }
  0x4c   : > { %863 = vmatmul.mubr.bf16.gmra.mxu0 %v961_v22  ;;  %879 = vmatmul.mubr.bf16.gmra.mxu1 %v962_v23 }
  0xf4   : > { %v852_v25 = vpop.f32.mrf.mxu0  ;;  %v868_v27 = vpop.f32.mrf.mxu1 }
  0xf5   : > { %v562_v28 = vmul.f32 %v852_v25, %v1151_v24  ;;  %v578_v29 = vmul.f32 %v868_v27, %v1151_v24 }
  0xf6   : > { %v426_v30 = vpop.f32.mrf.mxu0  ;;  %v490_v31 = vpop.f32.mrf.mxu1 }
  0xf7   : > { %v601_v32 = vadd.f32 %v1156_v26, %v562_v28  ;;  %v617_v33 = vadd.f32 %v1156_v26, %v578_v29  ;;  %v560_v34 = vmul.f32 %v1151_v24, %v426_v30  ;;  %v576_v35 = vmul.f32 %v1151_v24, %v490_v31 }
  0xf8   : > { %v853_v36 = vpop.f32.mrf.mxu0  ;;  %v869_v37 = vpop.f32.mrf.mxu1 }
  0xf9   : > { %v633_v38 = vmax.f32 %v601_v32, 0.0  ;;  %v649_v39 = vmax.f32 %v617_v33, 0.0  ;;  %v599_v40 = vadd.f32 %v1156_v26, %v560_v34  ;;  %v615_v41 = vadd.f32 %v1156_v26, %v576_v35 }
  0xfa   : > { %v563_v42 = vmul.f32 %v853_v36, %v1151_v24  ;;  %v579_v43 = vmul.f32 %v869_v37, %v1151_v24  ;;  %v429_v44 = vpop.f32.mrf.mxu0  ;;  %v493_v45 = vpop.f32.mrf.mxu1 }
  0xfb   : > { %665 = vst [vmem:[%s1170_s11 + $0x10] sm:$0xff] %v633_v38  ;;  %681 = vst [vmem:[%s1170_s11 + $0x90] sm:$0xff] %v649_v39  ;;  %v631_v46 = vmax.f32 %v599_v40, 0.0  ;;  %v647_v47 = vmax.f32 %v615_v41, 0.0  ;;  %v561_v48 = vmul.f32 %v1151_v24, %v429_v44  ;;  %v577_v49 = vmul.f32 %v1151_v24, %v493_v45 }
  0xfc   : > { %v602_v50 = vadd.f32 %v1156_v26, %v563_v42  ;;  %v618_v51 = vadd.f32 %v1156_v26, %v579_v43  ;;  %v856_v52 = vpop.f32.mrf.mxu0  ;;  %v872_v53 = vpop.f32.mrf.mxu1 }
  0xfd   : > { %663 = vst [vmem:[%s1170_s11] sm:$0xff] %v631_v46  ;;  %679 = vst [vmem:[%s1170_s11 + $0x80] sm:$0xff] %v647_v47  ;;  %v600_v54 = vadd.f32 %v1156_v26, %v561_v48  ;;  %v616_v55 = vadd.f32 %v1156_v26, %v577_v49  ;;  %v566_v56 = vmul.f32 %v856_v52, %v1151_v24 }
  0xfe   : > { %v582_v57 = vmul.f32 %v872_v53, %v1151_v24  ;;  %v634_v58 = vmax.f32 %v602_v50, 0.0  ;;  %v650_v59 = vmax.f32 %v618_v51, 0.0  ;;  %v442_v60 = vpop.f32.mrf.mxu0  ;;  %v506_v61 = vpop.f32.mrf.mxu1 }
  0xff   : > { %v632_v62 = vmax.f32 %v600_v54, 0.0  ;;  %v648_v63 = vmax.f32 %v616_v55, 0.0  ;;  %v605_v0 = vadd.f32 %v1156_v26, %v566_v56  ;;  %v564_v2 = vmul.f32 %v1151_v24, %v442_v60 }
 0x100   : > { %v621_v1 = vadd.f32 %v1156_v26, %v582_v57  ;;  %666 = vst [vmem:[%s1170_s11 + $0x18] sm:$0xff] %v634_v58  ;;  %682 = vst [vmem:[%s1170_s11 + $0x98] sm:$0xff] %v650_v59  ;;  %v580_v3 = vmul.f32 %v1151_v24, %v506_v61  ;;  %v857_v4 = vpop.f32.mrf.mxu0  ;;  %v873_v5 = vpop.f32.mrf.mxu1 }
 0x101   : > { %664 = vst [vmem:[%s1170_s11 + $0x8] sm:$0xff] %v632_v62  ;;  %680 = vst [vmem:[%s1170_s11 + $0x88] sm:$0xff] %v648_v63  ;;  %v637_v6 = vmax.f32 %v605_v0, 0.0  ;;  %v567_v8 = vmul.f32 %v857_v4, %v1151_v24  ;;  %v583_v9 = vmul.f32 %v873_v5, %v1151_v24  ;;  %v603_v10 = vadd.f32 %v1156_v26, %v564_v2 }
 0x102   : > { %v653_v7 = vmax.f32 %v621_v1, 0.0  ;;  %v619_v11 = vadd.f32 %v1156_v26, %v580_v3  ;;  %v445_v12 = vpop.f32.mrf.mxu0  ;;  %v509_v13 = vpop.f32.mrf.mxu1 }
 0x103   : > { %669 = vst [vmem:[%s1170_s11 + $0x30] sm:$0xff] %v637_v6  ;;  %v606_v14 = vadd.f32 %v1156_v26, %v567_v8  ;;  %v622_v15 = vadd.f32 %v1156_v26, %v583_v9  ;;  %v565_v16 = vmul.f32 %v1151_v24, %v445_v12  ;;  %v581_v17 = vmul.f32 %v1151_v24, %v509_v13 }
 0x104   : > { %685 = vst [vmem:[%s1170_s11 + $0xb0] sm:$0xff] %v653_v7  ;;  %v635_v18 = vmax.f32 %v603_v10, 0.0  ;;  %v651_v19 = vmax.f32 %v619_v11, 0.0  ;;  %v860_v20 = vpop.f32.mrf.mxu0  ;;  %v876_v21 = vpop.f32.mrf.mxu1 }
 0x105   : > { %v638_v22 = vmax.f32 %v606_v14, 0.0  ;;  %v654_v23 = vmax.f32 %v622_v15, 0.0  ;;  %v604_v25 = vadd.f32 %v1156_v26, %v565_v16  ;;  %v620_v27 = vadd.f32 %v1156_v26, %v581_v17 }
 0x106   : > { %667 = vst [vmem:[%s1170_s11 + $0x20] sm:$0xff] %v635_v18  ;;  %683 = vst [vmem:[%s1170_s11 + $0xa0] sm:$0xff] %v651_v19  ;;  %v570_v28 = vmul.f32 %v860_v20, %v1151_v24  ;;  %v586_v29 = vmul.f32 %v876_v21, %v1151_v24  ;;  %v458_v30 = vpop.f32.mrf.mxu0  ;;  %v522_v31 = vpop.f32.mrf.mxu1 }
 0x107   : > { %670 = vst [vmem:[%s1170_s11 + $0x38] sm:$0xff] %v638_v22  ;;  %686 = vst [vmem:[%s1170_s11 + $0xb8] sm:$0xff] %v654_v23  ;;  %v636_v32 = vmax.f32 %v604_v25, 0.0  ;;  %v652_v33 = vmax.f32 %v620_v27, 0.0  ;;  %v568_v34 = vmul.f32 %v1151_v24, %v458_v30  ;;  %v584_v35 = vmul.f32 %v1151_v24, %v522_v31 }
 0x108   : > { %v609_v36 = vadd.f32 %v1156_v26, %v570_v28  ;;  %v625_v37 = vadd.f32 %v1156_v26, %v586_v29  ;;  %v861_v38 = vpop.f32.mrf.mxu0  ;;  %v877_v39 = vpop.f32.mrf.mxu1 }
 0x109   : > { %668 = vst [vmem:[%s1170_s11 + $0x28] sm:$0xff] %v636_v32  ;;  %684 = vst [vmem:[%s1170_s11 + $0xa8] sm:$0xff] %v652_v33  ;;  %v607_v40 = vadd.f32 %v1156_v26, %v568_v34  ;;  %v623_v41 = vadd.f32 %v1156_v26, %v584_v35  ;;  %v571_v42 = vmul.f32 %v861_v38, %v1151_v24 }
 0x10a   : > { %v587_v43 = vmul.f32 %v877_v39, %v1151_v24  ;;  %v641_v44 = vmax.f32 %v609_v36, 0.0  ;;  %v657_v45 = vmax.f32 %v625_v37, 0.0  ;;  %v461_v46 = vpop.f32.mrf.mxu0  ;;  %v525_v47 = vpop.f32.mrf.mxu1 }
 0x10b   : > { %v639_v48 = vmax.f32 %v607_v40, 0.0  ;;  %v655_v49 = vmax.f32 %v623_v41, 0.0  ;;  %v610_v50 = vadd.f32 %v1156_v26, %v571_v42  ;;  %v569_v52 = vmul.f32 %v1151_v24, %v461_v46 }
 0x10c   : > { %v626_v51 = vadd.f32 %v1156_v26, %v587_v43  ;;  %673 = vst [vmem:[%s1170_s11 + $0x50] sm:$0xff] %v641_v44  ;;  %689 = vst [vmem:[%s1170_s11 + $0xd0] sm:$0xff] %v657_v45  ;;  %v585_v53 = vmul.f32 %v1151_v24, %v525_v47  ;;  %v864_v54 = vpop.f32.mrf.mxu0  ;;  %v880_v55 = vpop.f32.mrf.mxu1 }
 0x10d   : > { %671 = vst [vmem:[%s1170_s11 + $0x40] sm:$0xff] %v639_v48  ;;  %687 = vst [vmem:[%s1170_s11 + $0xc0] sm:$0xff] %v655_v49  ;;  %v642_v56 = vmax.f32 %v610_v50, 0.0  ;;  %v574_v58 = vmul.f32 %v864_v54, %v1151_v24  ;;  %v590_v59 = vmul.f32 %v880_v55, %v1151_v24  ;;  %v608_v60 = vadd.f32 %v1156_v26, %v569_v52 }
 0x10e   : > { %v658_v57 = vmax.f32 %v626_v51, 0.0  ;;  %v624_v61 = vadd.f32 %v1156_v26, %v585_v53  ;;  %v474_v62 = vpop.f32.mrf.mxu0  ;;  %v538_v63 = vpop.f32.mrf.mxu1 }
 0x10f   : > { %674 = vst [vmem:[%s1170_s11 + $0x58] sm:$0xff] %v642_v56  ;;  %v613_v0 = vadd.f32 %v1156_v26, %v574_v58  ;;  %v629_v1 = vadd.f32 %v1156_v26, %v590_v59  ;;  %v572_v2 = vmul.f32 %v1151_v24, %v474_v62  ;;  %v588_v3 = vmul.f32 %v1151_v24, %v538_v63 }
 0x110   : > { %690 = vst [vmem:[%s1170_s11 + $0xd8] sm:$0xff] %v658_v57  ;;  %v640_v4 = vmax.f32 %v608_v60, 0.0  ;;  %v656_v5 = vmax.f32 %v624_v61, 0.0  ;;  %v865_v6 = vpop.f32.mrf.mxu0  ;;  %v881_v7 = vpop.f32.mrf.mxu1 }
 0x111   : > { %v645_v8 = vmax.f32 %v613_v0, 0.0  ;;  %v661_v9 = vmax.f32 %v629_v1, 0.0  ;;  %v611_v10 = vadd.f32 %v1156_v26, %v572_v2  ;;  %v627_v11 = vadd.f32 %v1156_v26, %v588_v3 }
 0x112   : > { %672 = vst [vmem:[%s1170_s11 + $0x48] sm:$0xff] %v640_v4  ;;  %688 = vst [vmem:[%s1170_s11 + $0xc8] sm:$0xff] %v656_v5  ;;  %v575_v12 = vmul.f32 %v865_v6, %v1151_v24  ;;  %v591_v13 = vmul.f32 %v881_v7, %v1151_v24  ;;  %v477_v14 = vpop.f32.mrf.mxu0  ;;  %v541_v15 = vpop.f32.mrf.mxu1 }
 0x113   : > { %677 = vst [vmem:[%s1170_s11 + $0x70] sm:$0xff] %v645_v8  ;;  %693 = vst [vmem:[%s1170_s11 + $0xf0] sm:$0xff] %v661_v9  ;;  %v643_v16 = vmax.f32 %v611_v10, 0.0  ;;  %v659_v17 = vmax.f32 %v627_v11, 0.0  ;;  %v573_v18 = vmul.f32 %v1151_v24, %v477_v14  ;;  %v589_v19 = vmul.f32 %v1151_v24, %v541_v15 }
 0x114   : > { %v614_v20 = vadd.f32 %v1156_v26, %v575_v12  ;;  %v630_v21 = vadd.f32 %v1156_v26, %v591_v13 }
 0x115   : > { %675 = vst [vmem:[%s1170_s11 + $0x60] sm:$0xff] %v643_v16  ;;  %691 = vst [vmem:[%s1170_s11 + $0xe0] sm:$0xff] %v659_v17  ;;  %v612_v22 = vadd.f32 %v1156_v26, %v573_v18  ;;  %v628_v23 = vadd.f32 %v1156_v26, %v589_v19 }
 0x116   : > { %v646_v25 = vmax.f32 %v614_v20, 0.0  ;;  %v662_v27 = vmax.f32 %v630_v21, 0.0 }
 0x117   : > { %v644_v24 = vmax.f32 %v612_v22, 0.0  ;;  %v660_v28 = vmax.f32 %v628_v23, 0.0 }
 0x118   : > { %678 = vst [vmem:[%s1170_s11 + $0x78] sm:$0xff] %v646_v25  ;;  %694 = vst [vmem:[%s1170_s11 + $0xf8] sm:$0xff] %v662_v27 }
 0x119   : > { %676 = vst [vmem:[%s1170_s11 + $0x68] sm:$0xff] %v644_v24  ;;  %692 = vst [vmem:[%s1170_s11 + $0xe8] sm:$0xff] %v660_v28 }
 0x11a   : > { %976 = shalt.err (!%p973_p3)
}
 0x11b   : > { %s977_s30 = scalar_lea.hbm %s1259_s19, 4096  ;;  %s981_s7 = scalar_lea.hbm %s1313_s4, 8192 }
 0x11c   : > { %p978_p4 = scmp.ne.s32.totalorder %s1259_s19, %s977_s30  ;;  %p982_p9 = scmp.lt.s32.totalorder %s1259_s19, %s1313_s4 }
 0x11d   : > { %p983_p10 = scmp.lt.s32.totalorder %s981_s7, %s977_s30 }
 0x11e   : > { %p979_p7 = pnand %p978_p4, %p1091_p5 }
 0x11f   : > { %p984_p11 = por %p983_p10, %p982_p9 }
 0x120   : > { %p980_p8 = pneg %p979_p7 }
 0x122   : > { %p985_p12 = pnand %p984_p11, %p980_p8 }
 0x124   : > { %988 = shalt.err (!%p985_p12)
}
 0x125   : > { %s1026_s10 = smov 128   ;;  %s1027_s11 = smov 8  }
 0x126   : > { %898 = dma.vmem_to_hbm [thread:$0]  (%p1091_p5), %s1261_s13, 4096, %s1259_s19, %s1269_s22, %s1026_s10, %s1026_s10, %s1027_s11  }
 0x127 PF: > { %p904_p13 = scmp.ge.s32.totalorder %s1023_s18, 2  ;;  %s724_s12 = sand.u32 1, %s1011_s15  }
 0x128   : > { %s725_s14 = scalar_lea.sflag [#allocation3], %s724_s12 }
 0x129   : > { %p901_p0 = pnand %p904_p13, %p1095_p6 }
 0x12b   : > { %p902_p1 = pneg %p901_p0 }
 0x12d   : > { %1006 = dma.done.wait (%p902_p1), %s725_s14, 4096  }
 0x12e   : > { %1008 = vsyncadd (%p902_p1), %s725_s14, 4294963200  ;;  %p14_p2 = scmp.ge.s32.totalorder %s1078_s21, 4   ;;  %s1316_s15 = smov %s1015_s16 }
 0x12f   : > { %s1317_s16 = smov %s1019_s17  ;;  %s1318_s17 = smov %s1089_s24 }
 0x130   : > { %s1319_s18 = smov %s1078_s21  ;;  %16 = sbr.rel (!%p14_p2) target bundleno = 3 (0x3), region = 71 }
 0x135   :  { %730 = vsyncpa [#allocation3], 1 }
 0x136   :  { %732 = vsyncpa [#allocation3 + $0x1], 1 }

</bundles_post_ra>
